<compile_context>
chip_gen: v7x
topology: tpu7x:2x2x1
jax: 0.10.0
libtpu: 0.0.40
codegen_flags: <defaults>
</compile_context>

<pallas_src>
import functools

import jax
import jax.numpy as jnp
from jax import lax
from jax.experimental import pallas as pl
from jax.experimental.pallas import tpu as pltpu


def _round_up(x, m):
    return (x + m - 1) // m * m


def _conv1d_kernel(x_ref, w_ref, b_ref, o_ref, x_pad_ref, *,
                   kernel_size, stride, pad, length, l_tile, num_l_tiles):
    # x_ref:     (1, Cin, L)        one batch row, caller dtype (e.g. f32)
    # w_ref:     (Cout, K*Cin)      lane-dense weight slab, compute dtype (bf16)
    # b_ref:     (Cout, 1)          bias, f32
    # o_ref:     (1, Cout, L_tile)  output tile, lane-dense in L
    # x_pad_ref: (Cin, L_scratch)   zero-padded input row (VMEM scratch, bf16)
    j = pl.program_id(1)
    cin = x_pad_ref.shape[0]
    cout = o_ref.shape[1]

    # --- fused zero padding: build the padded row once per batch element ---
    @pl.when(j == 0)
    def _():
        x_pad_ref[...] = jnp.zeros_like(x_pad_ref)
        x_pad_ref[:, pad:pad + length] = x_ref[0].astype(x_pad_ref.dtype)

    win = (l_tile - 1) * stride + kernel_size  # input window needed per tile

    if stride > 1:
        # Strided taps: load the tile window once, take static strided slices.
        if num_l_tiles == 1:
            window = x_pad_ref[:, 0:win]
        else:
            window = x_pad_ref[:, pl.ds(j * l_tile * stride, win)]

    acc = jnp.zeros((cout, l_tile), dtype=jnp.float32)
    # K is small & static: unrolled loop, one small MXU matmul per tap with the
    # large L_tile dimension in the lanes (N dim of the matmul).
    for k in range(kernel_size):
        if stride == 1:
            if num_l_tiles == 1:
                x_k = x_pad_ref[:, k:k + l_tile]                # static ref slice
            else:
                base = pl.multiple_of(j * l_tile, l_tile)
                x_k = x_pad_ref[:, pl.ds(base + k, l_tile)]     # general path
        else:
            x_k = lax.slice(window, (0, k),
                            (cin, k + (l_tile - 1) * stride + 1), (1, stride))
        w_k = w_ref[:, k * cin:(k + 1) * cin]                   # (Cout, Cin)
        acc += jnp.dot(w_k, x_k, preferred_element_type=jnp.float32)

    acc += b_ref[...].astype(jnp.float32)                       # (Cout,1) bcast
    o_ref[0] = acc.astype(o_ref.dtype)


def same_pad_conv1d(x_ncl, weight, bias, *, stride=1,
                    compute_dtype=jnp.bfloat16, l_tile_max=512):
    """x_ncl: (N, Cin, L); weight: (Cout, Cin, K); bias: (Cout,) -> (N, Cout, L_out)."""
    n, cin, length = x_ncl.shape
    cout, cin_w, k_size = weight.shape
    assert cin_w == cin
    pad = (k_size - 1) // 2
    l_out = (length + 2 * pad - k_size) // stride + 1

    # L tiling: single lane-dense tile for short rows, 128-multiple tiles otherwise.
    l_tile = l_out if l_out <= l_tile_max else _round_up(l_tile_max, 128)
    num_l_tiles = -(-l_out // l_tile)

    win = (l_tile - 1) * stride + k_size
    l_scratch = _round_up(
        max(pad + length, (num_l_tiles - 1) * l_tile * stride + win), 128)

    # Lane-dense 2D weight slab: w2d[co, k*Cin + ci] = weight[co, ci, k].
    w2d = jnp.transpose(weight, (0, 2, 1)).reshape(cout, k_size * cin)
    w2d = w2d.astype(compute_dtype)
    b2d = bias.astype(jnp.float32).reshape(cout, 1)

    kernel = functools.partial(
        _conv1d_kernel, kernel_size=k_size, stride=stride, pad=pad,
        length=length, l_tile=l_tile, num_l_tiles=num_l_tiles)

    out_dtype = x_ncl.dtype
    flops = 2 * n * l_out * cout * cin * k_size
    bytes_accessed = (x_ncl.size * x_ncl.dtype.itemsize
                      + w2d.size * w2d.dtype.itemsize
                      + b2d.size * b2d.dtype.itemsize
                      + n * cout * l_out * jnp.dtype(out_dtype).itemsize)

    return pl.pallas_call(
        kernel,
        out_shape=jax.ShapeDtypeStruct((n, cout, l_out), out_dtype),
        grid_spec=pltpu.PrefetchScalarGridSpec(
            num_scalar_prefetch=0,
            grid=(n, num_l_tiles),
            in_specs=[
                # Whole unpadded input row per batch element; block index is
                # constant across L tiles so it is DMA'd only once per row.
                pl.BlockSpec((1, cin, length), lambda b, j: (b, 0, 0)),
                pl.BlockSpec((cout, k_size * cin), lambda b, j: (0, 0)),
                pl.BlockSpec((cout, 1), lambda b, j: (0, 0)),
            ],
            out_specs=pl.BlockSpec((1, cout, l_tile), lambda b, j: (b, 0, j)),
            scratch_shapes=[pltpu.VMEM((cin, l_scratch), compute_dtype)],
        ),
        compiler_params=pltpu.CompilerParams(
            dimension_semantics=("parallel", "arbitrary")),
        cost_estimate=pl.CostEstimate(
            flops=flops, transcendentals=0, bytes_accessed=bytes_accessed),
    )(x_ncl, w2d, b2d)


if __name__ == "__main__":
    # SamePadConv1d(in_channels=4, out_channels=8, kernel_size=3, stride=1)
    in_channels, out_channels, kernel_size, stride = 4, 8, 3, 1
    batch, length = 2, 16
    pad = (kernel_size - 1) // 2

    key = jax.random.PRNGKey(0)
    kx, kw, kb = jax.random.split(key, 3)
    x = jax.random.normal(kx, (batch, in_channels, length), dtype=jnp.float32)
    bound = 1.0 / (in_channels * kernel_size) ** 0.5
    weight = jax.random.uniform(
        kw, (out_channels, in_channels, kernel_size),
        minval=-bound, maxval=bound, dtype=jnp.float32)
    bias = jax.random.uniform(
        kb, (out_channels,), minval=-bound, maxval=bound, dtype=jnp.float32)

    y = same_pad_conv1d(x, weight, bias, stride=stride)
    y = jax.block_until_ready(y)

    # Reference with the same bf16-rounded inputs (kernel does bf16 matmul,
    # f32 accumulation), so only summation-order error remains.
    xr = x.astype(jnp.bfloat16).astype(jnp.float32)
    wr = weight.astype(jnp.bfloat16).astype(jnp.float32)
    y_ref = lax.conv_general_dilated(
        xr, wr, window_strides=(stride,), padding=[(pad, pad)],
        dimension_numbers=("NCH", "OIH", "NCH")) + bias[None, :, None]

    assert y.shape == y_ref.shape, (y.shape, y_ref.shape)
    assert jnp.allclose(y, y_ref, atol=1e-4, rtol=1e-4), \
        float(jnp.max(jnp.abs(y - y_ref)))
    print("KERNEL_OK")
</pallas_src>

<mosaic_0001>
module attributes {stable_mosaic.version = 11 : i64} {
  func.func @_conv1d_kernel(%arg0: i32, %arg1: i32, %arg2: memref<1x4x16xf32, #tpu.memory_space<vmem>>, %arg3: memref<8x12xbf16, #tpu.memory_space<vmem>>, %arg4: memref<8x1xf32, #tpu.memory_space<vmem>>, %arg5: memref<1x8x16xf32, #tpu.memory_space<vmem>>, %arg6: memref<4x128xbf16, #tpu.memory_space<vmem>>) attributes {dimension_semantics = [#tpu.dimension_semantics<parallel>, #tpu.dimension_semantics<arbitrary>], iteration_bounds = array<i64: 2, 1>, scalar_prefetch = 0 : i64, scratch_operands = 1 : i64, tpu.core_type = #tpu.core_type<tc>, window_params = [{transform_indices = @transform_0, window_bounds = array<i64: 1, 4, 16>}, {pipeline_mode = #tpu.pipeline_mode<synchronous>, transform_indices = @transform_1, window_bounds = array<i64: 8, 12>}, {pipeline_mode = #tpu.pipeline_mode<synchronous>, transform_indices = @transform_2, window_bounds = array<i64: 8, 1>}, {transform_indices = @transform_3, window_bounds = array<i64: 1, 8, 16>}]} {
    %c0_i32 = arith.constant 0 : i32
    %0 = arith.cmpi eq, %arg1, %c0_i32 : i32
    %1 = arith.extui %0 : i1 to i32
    %c0_i32_0 = arith.constant 0 : i32
    %2 = arith.cmpi ne, %1, %c0_i32_0 : i32
    scf.if %2 {
      %cst_16 = arith.constant 0.000000e+00 : bf16
      %22 = vector.broadcast %cst_16 : bf16 to vector<4x128xbf16>
      %c0_17 = arith.constant 0 : index
      %c0_18 = arith.constant 0 : index
      %23 = vector.load %arg6[%c0_17, %c0_18] : memref<4x128xbf16, #tpu.memory_space<vmem>>, vector<4x128xbf16>
      tpu.vector_store %arg6[%c0_17, %c0_18], %22 {strides = array<i32>} : memref<4x128xbf16, #tpu.memory_space<vmem>>, vector<4x128xbf16>,
      %c0_19 = arith.constant 0 : index
      %c0_20 = arith.constant 0 : index
      %c0_21 = arith.constant 0 : index
      %24 = vector.load %arg2[%c0_19, %c0_20, %c0_21] : memref<1x4x16xf32, #tpu.memory_space<vmem>>, vector<1x4x16xf32>
      %25 = vector.shape_cast %24 : vector<1x4x16xf32> to vector<4x16xf32>
      %26 = arith.truncf %25 : vector<4x16xf32> to vector<4x16xbf16>
      %c0_22 = arith.constant 0 : index
      %c1_23 = arith.constant 1 : index
      %27 = vector.load %arg6[%c0_22, %c1_23] : memref<4x128xbf16, #tpu.memory_space<vmem>>, vector<4x16xbf16>
      tpu.vector_store %arg6[%c0_22, %c1_23], %26 {strides = array<i32>} : memref<4x128xbf16, #tpu.memory_space<vmem>>, vector<4x16xbf16>,
    } else {
    }
    %cst = arith.constant 0.000000e+00 : f32
    %3 = vector.broadcast %cst : f32 to vector<8x16xf32>
    %c0 = arith.constant 0 : index
    %c0_1 = arith.constant 0 : index
    %4 = vector.load %arg6[%c0, %c0_1] : memref<4x128xbf16, #tpu.memory_space<vmem>>, vector<4x16xbf16>
    %c0_2 = arith.constant 0 : index
    %c0_3 = arith.constant 0 : index
    %5 = vector.load %arg3[%c0_2, %c0_3] : memref<8x12xbf16, #tpu.memory_space<vmem>>, vector<8x4xbf16>
    %cst_4 = arith.constant dense<0.000000e+00> : vector<8x16xf32>
    %6 = tpu.matmul %5, %4, %cst_4 {dimension_numbers = #tpu.dot_dimension_numbers<[1], [0], [0], [1], [0, 0, 1, 1], [], []>} : vector<8x4xbf16>, vector<4x16xbf16>, vector<8x16xf32> -> vector<8x16xf32>
    %7 = arith.addf %3, %6 : vector<8x16xf32>
    %c0_5 = arith.constant 0 : index
    %c1 = arith.constant 1 : index
    %8 = vector.load %arg6[%c0_5, %c1] : memref<4x128xbf16, #tpu.memory_space<vmem>>, vector<4x16xbf16>
    %c0_6 = arith.constant 0 : index
    %c4 = arith.constant 4 : index
    %9 = vector.load %arg3[%c0_6, %c4] : memref<8x12xbf16, #tpu.memory_space<vmem>>, vector<8x4xbf16>
    %cst_7 = arith.constant dense<0.000000e+00> : vector<8x16xf32>
    %10 = tpu.matmul %9, %8, %cst_7 {dimension_numbers = #tpu.dot_dimension_numbers<[1], [0], [0], [1], [0, 0, 1, 1], [], []>} : vector<8x4xbf16>, vector<4x16xbf16>, vector<8x16xf32> -> vector<8x16xf32>
    %11 = arith.addf %7, %10 : vector<8x16xf32>
    %c0_8 = arith.constant 0 : index
    %c2 = arith.constant 2 : index
    %12 = vector.load %arg6[%c0_8, %c2] : memref<4x128xbf16, #tpu.memory_space<vmem>>, vector<4x16xbf16>
    %c0_9 = arith.constant 0 : index
    %c8 = arith.constant 8 : index
    %13 = vector.load %arg3[%c0_9, %c8] : memref<8x12xbf16, #tpu.memory_space<vmem>>, vector<8x4xbf16>
    %cst_10 = arith.constant dense<0.000000e+00> : vector<8x16xf32>
    %14 = tpu.matmul %13, %12, %cst_10 {dimension_numbers = #tpu.dot_dimension_numbers<[1], [0], [0], [1], [0, 0, 1, 1], [], []>} : vector<8x4xbf16>, vector<4x16xbf16>, vector<8x16xf32> -> vector<8x16xf32>
    %15 = arith.addf %11, %14 : vector<8x16xf32>
    %c0_11 = arith.constant 0 : index
    %c0_12 = arith.constant 0 : index
    %16 = vector.load %arg4[%c0_11, %c0_12] : memref<8x1xf32, #tpu.memory_space<vmem>>, vector<8x1xf32>
    %17 = vector.broadcast %16 : vector<8x1xf32> to vector<8x16xf32>
    %18 = arith.addf %15, %17 : vector<8x16xf32>
    %c0_13 = arith.constant 0 : index
    %c0_14 = arith.constant 0 : index
    %c0_15 = arith.constant 0 : index
    %19 = vector.load %arg5[%c0_13, %c0_14, %c0_15] : memref<1x8x16xf32, #tpu.memory_space<vmem>>, vector<1x8x16xf32>
    %20 = vector.shape_cast %19 : vector<1x8x16xf32> to vector<8x16xf32>
    %21 = vector.shape_cast %18 : vector<8x16xf32> to vector<1x8x16xf32>
    tpu.vector_store %arg5[%c0_13, %c0_14, %c0_15], %21 {strides = array<i32>} : memref<1x8x16xf32, #tpu.memory_space<vmem>>, vector<1x8x16xf32>,
    return
  }
  func.func @transform_0(%arg0: i32, %arg1: i32) -> (i32, i32, i32) {
    %c0_i32 = arith.constant 0 : i32
    %c0_i32_0 = arith.constant 0 : i32
    %c0_i32_1 = arith.constant 0 : i32
    return %arg0, %c0_i32, %c0_i32_0 : i32, i32, i32
  }
  func.func @transform_1(%arg0: i32, %arg1: i32) -> (i32, i32) {
    %c0_i32 = arith.constant 0 : i32
    %c0_i32_0 = arith.constant 0 : i32
    %c0_i32_1 = arith.constant 0 : i32
    return %c0_i32, %c0_i32_0 : i32, i32
  }
  func.func @transform_2(%arg0: i32, %arg1: i32) -> (i32, i32) {
    %c0_i32 = arith.constant 0 : i32
    %c0_i32_0 = arith.constant 0 : i32
    %c0_i32_1 = arith.constant 0 : i32
    return %c0_i32, %c0_i32_0 : i32, i32
  }
  func.func @transform_3(%arg0: i32, %arg1: i32) -> (i32, i32, i32) {
    %c0_i32 = arith.constant 0 : i32
    %c0_i32_0 = arith.constant 0 : i32
    return %arg0, %c0_i32, %arg1 : i32, i32, i32
  }
}

</mosaic_0001>

<bundles_post_ra>
// kernel: tpu_custom_call.1
= control target key start
LH: loop header
LB: loop body
LE: loop exit
PB: predicated region body
PF: predicated region fallthrough
CT: control target
= control target key end

     0   :  { %8 = vsyncpa [#allocation4], 0  ;;  %s817_s0 = inlined_call_operand.vmem [shape: f32[2,4,16], index: 0, kind: input, shape index: {}]   ;;  %s818_s1 = inlined_call_operand.vmem [shape: bf16[8,12], index: 1, kind: input, shape index: {}]   ;;  %s819_s2 = inlined_call_operand.vmem [shape: f32[8,1], index: 2, kind: input, shape index: {}]   ;;  %s820_s3 = inlined_call_operand.hbm [shape: f32[2,8,16], index: 3, kind: output, shape index: {}]  }
   0x1   :  { %10 = vsyncpa [#allocation4 + $0x1], 0  ;;  %s687_s12 = smov 0   ;;  %s689_s13 = smov 0  }
   0x2   :  { %s691_s14 = smov 0   ;;  %s693_s15 = smov 0  }
   0x3   :  { %s695_s16 = smov 0   ;;  %s697_s17 = smov 0  }
   0x4 LB: > { %s468_s18 = sadd.s32 4294967295, %s655_s17   ;;  %s469_s19 = sadd.s32 4294967294, %s655_s17   ;;  %s655_s17 = sphi %s697_s17, %s16_s17   ;;  %s651_s16 = sphi %s695_s16, %s827_s16   ;;  %s647_s15 = sphi %s693_s15, %s826_s15   ;;  %s643_s14 = sphi %s691_s14, %s825_s14   ;;  %s639_s13 = sphi %s689_s13, %s824_s13   ;;  %s635_s12 = sphi %s687_s12, %s823_s12  }
   0x5   : > { %s28_s20 = sadd.s32 1, %s651_s16  ;;  %s105_s21 = sadd.s32 1, %s643_s14 }
   0x6   : > { %p30_p0 = scmp.ge.s32.totalorder %s28_s20, 2  ;;  %p115_p1 = scmp.ne.s32.totalorder %s643_s14, %s639_s13 }
   0x7   : > { %p116_p2 = scmp.eq.s32.totalorder %s468_s18, 1  ;;  %p121_p3 = scmp.ne.s32.totalorder %s639_s13, %s635_s12 }
   0x8   : > { %s829_s20 = smov (%p30_p0, %s28_s20), 0  ;;  %p122_p5 = scmp.eq.s32.totalorder %s469_s19, 1 }
   0x9   : > { %p727_p4 = por %p116_p2, %p115_p1  ;;  %s100_s23 = ssub.s32 %s651_s16, %s829_s20 }
   0xa   : > { %p472_p6 = scmp.ge.s32.totalorder %s655_s17, 1  ;;  %p103_p7 = scmp.eq.s32.totalorder %s100_s23, 0 }
   0xb   : > { %p734_p8 = por %p122_p5, %p121_p3  ;;  %p153_p9 = scmp.lt.s32.totalorder %s655_s17, 3 }
   0xc   : > { %s740_s25 = scalar_select %p103_p7, %s643_s14, %s105_s21  }
   0xd   : > { %p154_p10 = pnand %p472_p6, %p153_p9 }
   0xe   : > { %p176_p11 = scmp.lt.s32.totalorder (!%p154_p10), %s647_s15, 1  ;;  %v192_v0 = vlaneseq (!%p154_p10)  ;;  %v657_v1 = vmov (!%p154_p10), 1983009808   ;;  %v658_v3 = vmov (!%p154_p10), 0   ;;  %v202_v4 = vld [vmem:[%s818_s1] sm:$0xf] (!%p154_p10) }
   0xf   : > { %157 = sbr.rel (%p154_p10) target bundleno = 514 (0x202), region = 32  ;;  %v190_v2 = vunpack.c.l.s4 (!%p154_p10), %v657_v1  ;;  %185 = vst [vmem:[#allocation2] sm:$0x3] (!%p154_p10), %v658_v3  ;;  %573 = vset.pattern.permute.xlu1 (!%p154_p10), %v658_v3  ;;  %574 = vset.pattern.permute.xlu0 (!%p154_p10), %v658_v3  ;;  %v475_v6 = vcombine.low (!%p154_p10), %v202_v4, %v202_v4  ;;  %v659_v7 = vmov (!%p154_p10), 0.0   ;;  %s660_s30 = smov (!%p154_p10), 124   ;;  %vm199_vm0 = vcmask (!%p154_p10), 132104  }
  0x10   : > { %v193_v5 = vshrl.u32 (!%p154_p10), %v192_v0, 7  ;;  %497 = vmatprep.subr.bf16.mxu1 (!%p154_p10), %v659_v7  ;;  %491 = vmatprep.subr.bf16.mxu0 (!%p154_p10), %v659_v7  ;;  %s661_s7 = smov (!%p154_p10), 1   ;;  %vm662_vm1 = vmmov (!%p154_p10), 0   ;;  %vm222_vm2 = vcmask (!%p154_p10), 1041408   ;;  %s663_s8 = smov (!%p154_p10), 126   ;;  %vm218_vm3 = vcmask (!%p154_p10), 31744  }
  0x11   : > { %v191_v8 = vunpack.c.0.s8 (!%p154_p10), %v190_v2  ;;  %206 = vrot.lane.b32.xlu1 (!%p154_p10), %v475_v6, %s660_s30  ;;  %493 = vmatprep.mubr.msk.bf16.mxu0 (!%p154_p10), %vm662_vm1, %v659_v7  ;;  %v376_v18 = vld [vmem:[%s819_s2] sm:$0xff] (!%p154_p10)  ;;  %s664_s11 = smov (!%p154_p10), 127   ;;  %s665_s21 = smov (!%p154_p10), 120   ;;  %vm383_vm4 = vcmask (!%p154_p10), 130048  }
  0x12   : > { %499 = vmatprep.mubr.msk.bf16.mxu1 (!%p154_p10), %vm662_vm1, %v659_v7  ;;  %v576_v19 = vld [vmem:[%s818_s1] ss:$0 sps:$4 sm:$0xff] (!%p154_p10)   ;;  %s173_s23 = sand.u32 (!%p154_p10), 1, %s639_s13   ;;  %s482_s27 = sshll.u32 (!%p154_p10), %s647_s15, 7 }
  0x13   : > { %v194_v9 = vsub.s32 (!%p154_p10), %v191_v8, %v193_v5  ;;  %s473_s26 = sshll.u32 (!%p154_p10), %s173_s23, 3  ;;  %s770_s5 = scalar_lea.hbm (!%p154_p10), %s820_s3, %s482_s27 }
  0x16   : > { %s177_s28 = scalar_select %p176_p11, %s647_s15, 1 }
  0x17   : > { %s386_s15 = scalar_lea.sflag [#allocation4], %s173_s23 }
  0x18   : > { %s474_s29 = sshll.u32 %s177_s28, 2  ;;  %s175_s28 = scalar_lea.vmem [#allocation3], %s473_s26 }
  0x19   : > { %s179_s6 = scalar_lea.vmem %s817_s0, %s474_s29  ;;  %s400_s29 = sshll.u32 %s175_s28, 4  ;;  %s772_s29 = int_to_ptr.vmem [resolvable:$true] %s400_s29 }
  0x1a   : > { %v186_v10 = vld [vmem:[%s179_s6] sm:$0xf]  ;;  %s577_s6 = scalar_lea.vmem %s772_s29, 128 }
  0x1b   : > { %v187_v11 = vpack.c.bf16 %v186_v10, %v186_v10  ;;  %p578_p12 = scmp.ne.s32.totalorder %s772_s29, %s577_s6 }
  0x1d   : > { %v195_v12 = vrot.slane %v187_v11, %v194_v9  ;;  %p579_p13 = pnand %p578_p12, %p727_p4 }
  0x1f   : > { %196 = vrot.lane.b32.xlu0 %v195_v12, %s661_s7  ;;  %p580_p0 = pneg %p579_p13  ;;  %s666_s7 = smov [#allocation3]  }
  0x83   : > { %v207_v20 = vpop.permute.xlu1 %206 }
  0x91   : > { %v197_v13 = vpop.permute.xlu0 %196 }
  0x92   : > { %200 = vst.msk [vmem:[#allocation2] sm:$0x3] %vm199_vm0, %v197_v13 }
  0x99   : > { %v479_v14 = vld.sshfl [vmem:[#allocation2] sm:$0x3 pattern:$0x76325410] }
  0x9a   : > { %v201_v15 = vld [vmem:[#allocation2] sm:$0x3]  ;;  %327 = vrot.lane.b32.xlu1 %v479_v14, %s663_s8  ;;  %s581_s8 = sshll.u32 %s666_s7, 4  ;;  %s582_s8 = int_to_ptr.vmem [resolvable:$false] %s581_s8 }
  0x9b   : > { %v215_v16 = vrot.slane %v201_v15, %v194_v9  ;;  %v270_v17 = vsel %vm222_vm2, %v201_v15, 0  ;;  %s583_s9 = scalar_lea.vmem %s582_s8, 256  ;;  %p584_p1 = scmp.lt.s32.totalorder %s772_s29, %s582_s8 }
  0x9c   : > { %498 = vmatpush3.bf16.msra.mxu1 %v270_v17  ;;  %p585_p2 = scmp.lt.s32.totalorder %s583_s9, %s577_s6 }
  0x9d   : > { %216 = vrot.lane.b32.xlu0 %v215_v16, %s664_s11 }
  0x9e   : > { %379 = vperm.xlu1 %573, %v376_v18   ;;  %p586_p3 = por %p585_p2, %p584_p1 }
  0x9f   : > { %500 = vmatmul.mubr.msk.bf16.vlgmr.msra.gmra.mrb[0].mxu1 %vm218_vm3, %v202_v4 }
  0xa0   : > { %p587_p5 = pnand %p586_p3, %p580_p0 }
  0xa1   : > { %317 = vrot.lane.b32.xlu0 %v576_v19, %s665_s21 }
 0x10c   : > { %v328_v23 = vpop.permute.xlu1 %327 }
 0x10d   : > { %v333_v24 = vsel %vm222_vm2, %v328_v23, 0 }
 0x10f   : > { %v217_v21 = vpop.permute.xlu0 %216 }
 0x110   : > { %v224_v22 = vsel %vm222_vm2, %v217_v21, 0 }
 0x111   : > { %492 = vmatpush3.bf16.msra.mxu0 %v224_v22 }
 0x112   : > { %503 = vmatprep.subr.bf16.mxu0 %v659_v7 }
 0x113   : > { %v318_v25 = vpop.permute.xlu0 %317 }
 0x114   : > { %494 = vmatmul.mubr.msk.bf16.vlgmr.msra.gmra.mrb[0].mxu0 %vm218_vm3, %v207_v20 }
 0x115   : > { %504 = vmatpush3.bf16.msra.mxu0 %v333_v24  ;;  %505 = vmatprep.mubr.msk.bf16.mxu0 %vm662_vm1, %v659_v7 }
 0x11c   : > { %506 = vmatmul.mubr.msk.bf16.vlgmr.msra.gmra.mrb[4].mxu0 %vm218_vm3, %v318_v25 }
 0x11d   : > { %v380_v36 = vpop.permute.xlu1 %379 }
 0x172   : > { %v306_v26 = vpop.f32.mrb[0].mxu1 }
 0x173   : > { %v501_v27 = vpop.f32.mrb[1].mxu1 }
 0x174   : > { %v309_v28 = vpop.f32.mrb[2].mxu1 }
 0x175   : > { %v502_v29 = vpop.f32.mrb[3].mxu1 }
 0x1e7   : > { %v260_v30 = vpop.f32.mrb[0].mxu0 }
 0x1e8   : > { %v307_v31 = vadd.f32 %v306_v26, %v260_v30  ;;  %v495_v32 = vpop.f32.mrb[1].mxu0 }
 0x1e9   : > { %v263_v33 = vpop.f32.mrb[2].mxu0 }
 0x1ea   : > { %v496_v34 = vpop.f32.mrb[3].mxu0 }
 0x1ef   : > { %v369_v35 = vpop.f32.mrb[4].mxu0 }
 0x1f0   : > { %v375_v37 = vadd.f32 %v369_v35, %v307_v31  ;;  %v507_v38 = vpop.f32.mrb[5].mxu0 }
 0x1f1   : > { %v372_v39 = vpop.f32.mrb[6].mxu0 }
 0x1f2   : > { %v382_v40 = vadd.f32 %v380_v36, %v375_v37  ;;  %v508_v41 = vpop.f32.mrb[7].mxu0 }
 0x1f4   : > { %384 = vst.msk [vmem:[%s175_s28] sm:$0xff] %vm383_vm4, %v382_v40 }
 0x1f5   : > { %590 = shalt.err (!%p587_p5)
}
 0x1f6   : > { %s591_s10 = scalar_lea.hbm %s770_s5, 128  ;;  %s595_s19 = scalar_lea.hbm %s820_s3, 256 }
 0x1f7   : > { %p592_p6 = scmp.ne.s32.totalorder %s770_s5, %s591_s10  ;;  %p596_p10 = scmp.lt.u32.totalorder %s770_s5, %s820_s3 }
 0x1f8   : > { %p597_p11 = scmp.lt.u32.totalorder %s595_s19, %s591_s10  ;;  %p599_p13 = scmp.lt.u32.totalorder %s591_s10, %s770_s5 }
 0x1f9   : > { %p593_p7 = pnand %p592_p6, %p727_p4 }
 0x1fa   : > { %p598_p12 = por %p597_p11, %p596_p10 }
 0x1fb   : > { %p594_p9 = pneg %p593_p7 }
 0x1fc   : > { %p600_p0 = por %p599_p13, %p598_p12 }
 0x1fe   : > { %p601_p1 = pnand %p600_p0, %p594_p9 }
 0x200   : > { %604 = shalt.err (!%p601_p1)
}
 0x201   : > { %509 = dma.vmem_to_hbm [thread:$0]  (%p727_p4), %s772_s29, 128, %s770_s5, %s386_s15  }
 0x202 PF: > { %p515_p2 = scmp.ge.s32.totalorder %s655_s17, 2  ;;  %s412_s26 = sand.u32 1, %s635_s12  }
 0x203   : > { %s413_s27 = scalar_lea.sflag [#allocation4], %s412_s26 }
 0x204   : > { %p512_p3 = pnand %p515_p2, %p734_p8 }
 0x206   : > { %630 = dma.done.wait (!%p512_p3), %s413_s27, 128  }
 0x207   : > { %632 = vsyncadd (!%p512_p3), %s413_s27, 4294967168  ;;  %s16_s17 = sadd.s32 1, %s655_s17   ;;  %s823_s12 = smov %s639_s13 }
 0x208   : > { %p13_p5 = scmp.ge.s32.totalorder %s16_s17, 4   ;;  %s824_s13 = smov %s643_s14 }
 0x209   : > { %s825_s14 = smov %s740_s25  ;;  %s826_s15 = smov %s651_s16 }
 0x20a   : > { %s827_s16 = smov %s829_s20  ;;  %15 = sbr.rel (!%p13_p5) target bundleno = 4 (0x4), region = 71 }
 0x211   :  { %418 = vsyncpa [#allocation4], 1 }
 0x212   :  { %420 = vsyncpa [#allocation4 + $0x1], 1 }

</bundles_post_ra>
